<compile_context>
chip_gen: v6e
topology: v6e:2x2x1
jax: 0.10.0
libtpu: 0.0.40
codegen_flags: <defaults>
</compile_context>

<pallas_src>
import jax
import jax.numpy as jnp
from jax.experimental import pallas as pl
from jax.experimental.pallas import tpu as pltpu


# ---------------------------------------------------------------------------
# Pass 1: per-feature sum / sum-of-squares of h = x @ W1 over the whole batch.
# Grid axis is a reduction ("arbitrary"); the (1, mid) outputs are resident
# accumulators (constant out index_map), initialized at the first grid step.
# ---------------------------------------------------------------------------
def stats_kernel(x_ref, w1_ref, sum_ref, sumsq_ref):
    @pl.when(pl.program_id(0) == 0)
    def _():
        sum_ref[...] = jnp.zeros_like(sum_ref)
        sumsq_ref[...] = jnp.zeros_like(sumsq_ref)

    # bf16 operands, f32 accumulate on the MXU.
    h = jnp.dot(x_ref[...], w1_ref[...], preferred_element_type=jnp.float32)
    sum_ref[...] += jnp.sum(h, axis=0, keepdims=True)
    sumsq_ref[...] += jnp.sum(h * h, axis=0, keepdims=True)


# ---------------------------------------------------------------------------
# Pass 2: per row-tile: h = x @ W1, folded-BN scale/shift, ReLU, Linear2.
# Independent over row tiles -> "parallel".
# ---------------------------------------------------------------------------
def head_kernel(x_ref, w1_ref, scale_ref, shift_ref, w2_ref, b2_ref, o_ref):
    h = jnp.dot(x_ref[...], w1_ref[...], preferred_element_type=jnp.float32)

    # Folded BatchNorm + ReLU: 1 mul + 1 add (+max) per element.
    hn = jnp.maximum(h * scale_ref[...] + shift_ref[...], 0.0)

    # TODO(synk): Dropout p=0.0 is identity; p>0 would need pltpu.prng_seed /
    # pltpu.prng_random_bits masking seeded per grid step.

    out = jnp.dot(hn.astype(jnp.bfloat16), w2_ref[...],
                  preferred_element_type=jnp.float32)
    o_ref[...] = (out + b2_ref[...]).astype(o_ref.dtype)


def classifier_forward(x, w1, gamma, beta, w2, b2, *, block_n=512, eps=1e-5):
    """x: (N, inplanes); w1: (inplanes, mid); w2: (mid, ouplanes).

    Weights are stored (in_features, out_features) so the kernel computes
    x @ W directly (== PyTorch x @ W.T with W of shape (out, in)).
    """
    n, inp = x.shape
    mid = w1.shape[1]
    oup = w2.shape[1]

    # ---- wrapper-side prep: bf16 MXU feeds, lane-dense padded output ----
    x_bf = x.astype(jnp.bfloat16)
    w1_bf = w1.astype(jnp.bfloat16)

    oup_pad = ((oup + 127) // 128) * 128
    w2_pad = jnp.zeros((mid, oup_pad), jnp.bfloat16).at[:, :oup].set(
        w2.astype(jnp.bfloat16))
    b2_pad = jnp.zeros((1, oup_pad), jnp.float32).at[:, :oup].set(
        b2.reshape(1, oup).astype(jnp.float32))

    # ---- row tiling: multiple of 8 sublanes, capped at block_n ----
    tm = min(block_n, ((n + 7) // 8) * 8)
    n_pad = ((n + tm - 1) // tm) * tm
    if n_pad != n:
        # zero rows contribute 0 to sum/sumsq, so batch stats stay exact
        x_bf = jnp.pad(x_bf, ((0, n_pad - n), (0, 0)))
    grid = (n_pad // tm,)

    cparams_stats = pltpu.CompilerParams(
        dimension_semantics=("arbitrary",), vmem_limit_bytes=48 << 20)
    cparams_head = pltpu.CompilerParams(
        dimension_semantics=("parallel",), vmem_limit_bytes=48 << 20)

    # ---- pass 1: batch statistics of h over the full batch ----
    h_sum, h_sumsq = pl.pallas_call(
        stats_kernel,
        out_shape=(jax.ShapeDtypeStruct((1, mid), jnp.float32),
                   jax.ShapeDtypeStruct((1, mid), jnp.float32)),
        grid=grid,
        in_specs=[
            pl.BlockSpec((tm, inp), lambda i: (i, 0)),   # x tile
            pl.BlockSpec((inp, mid), lambda i: (0, 0)),  # W1 resident
        ],
        out_specs=(
            pl.BlockSpec((1, mid), lambda i: (0, 0)),    # sum accumulator
            pl.BlockSpec((1, mid), lambda i: (0, 0)),    # sumsq accumulator
        ),
        compiler_params=cparams_stats,
    )(x_bf, w1_bf)

    # ---- fold BN into per-feature scale/shift (tiny (1, mid) vectors) ----
    inv_n = 1.0 / n
    mean = h_sum * inv_n
    var = jnp.maximum(h_sumsq * inv_n - mean * mean, 0.0)   # biased variance
    g = gamma.reshape(1, mid).astype(jnp.float32)
    b = beta.reshape(1, mid).astype(jnp.float32)
    scale = g * jax.lax.rsqrt(var + eps)
    shift = b - mean * scale

    # ---- pass 2: normalize + ReLU + Linear2, tiled over rows ----
    out_pad = pl.pallas_call(
        head_kernel,
        out_shape=jax.ShapeDtypeStruct((n_pad, oup_pad), jnp.float32),
        grid=grid,
        in_specs=[
            pl.BlockSpec((tm, inp), lambda i: (i, 0)),       # x tile
            pl.BlockSpec((inp, mid), lambda i: (0, 0)),      # W1 resident
            pl.BlockSpec((1, mid), lambda i: (0, 0)),        # scale
            pl.BlockSpec((1, mid), lambda i: (0, 0)),        # shift
            pl.BlockSpec((mid, oup_pad), lambda i: (0, 0)),  # W2 (padded)
            pl.BlockSpec((1, oup_pad), lambda i: (0, 0)),    # b2 (padded)
        ],
        out_specs=pl.BlockSpec((tm, oup_pad), lambda i: (i, 0)),
        compiler_params=cparams_head,
    )(x_bf, w1_bf, scale, shift, w2_pad, b2_pad)

    return out_pad[:n, :oup]


def reference_forward(x, w1, gamma, beta, w2, b2, eps=1e-5):
    h = x @ w1
    mean = jnp.mean(h, axis=0, keepdims=True)
    var = jnp.mean((h - mean) ** 2, axis=0, keepdims=True)
    hn = (h - mean) / jnp.sqrt(var + eps) * gamma + beta
    hn = jnp.maximum(hn, 0.0)
    return hn @ w2 + b2


if __name__ == "__main__":
    # Module-consistent small shapes: inplanes=128, hidreduce=1.0 -> mid=128,
    # ouplanes=16, batch=16.
    N, INPLANES, OUPLANES = 16, 128, 16
    HIDREDUCE = 1.0
    MIDPLANES = int(INPLANES // HIDREDUCE)

    key = jax.random.PRNGKey(0)
    kx, kw1, kg, kb, kw2, kb2 = jax.random.split(key, 6)

    x = jax.random.normal(kx, (N, INPLANES), dtype=jnp.float32)
    w1 = jax.random.normal(kw1, (INPLANES, MIDPLANES), dtype=jnp.float32) * 0.05
    gamma = 1.0 + 0.1 * jax.random.normal(kg, (1, MIDPLANES), dtype=jnp.float32)
    beta = 0.1 * jax.random.normal(kb, (1, MIDPLANES), dtype=jnp.float32)
    w2 = jax.random.normal(kw2, (MIDPLANES, OUPLANES), dtype=jnp.float32) * 0.05
    b2 = 0.1 * jax.random.normal(kb2, (1, OUPLANES), dtype=jnp.float32)

    out = classifier_forward(x, w1, gamma, beta, w2, b2)
    out = jax.block_until_ready(out)

    ref = reference_forward(x, w1, gamma, beta, w2, b2)
    assert out.shape == (N, OUPLANES)
    # bf16 MXU feeds (f32 accumulate) vs the f32 reference -> loosened tolerance.
    assert jnp.allclose(out, ref, atol=5e-2, rtol=5e-2), "mismatch vs JAX reference"

    print("KERNEL_OK")
</pallas_src>

<mosaic_0001>
module attributes {stable_mosaic.version = 11 : i64} {
  func.func @stats_kernel(%arg0: i32, %arg1: memref<16x128xbf16, #tpu.memory_space<vmem>>, %arg2: memref<128x128xbf16, #tpu.memory_space<vmem>>, %arg3: memref<1x128xf32, #tpu.memory_space<vmem>>, %arg4: memref<1x128xf32, #tpu.memory_space<vmem>>) attributes {dimension_semantics = [#tpu.dimension_semantics<arbitrary>], iteration_bounds = array<i64: 1>, scalar_prefetch = 0 : i64, scratch_operands = 0 : i64, tpu.core_type = #tpu.core_type<tc>, window_params = [{transform_indices = @transform_0, window_bounds = array<i64: 16, 128>}, {pipeline_mode = #tpu.pipeline_mode<synchronous>, transform_indices = @transform_1, window_bounds = array<i64: 128, 128>}, {pipeline_mode = #tpu.pipeline_mode<synchronous>, transform_indices = @transform_2, window_bounds = array<i64: 1, 128>}, {pipeline_mode = #tpu.pipeline_mode<synchronous>, transform_indices = @transform_3, window_bounds = array<i64: 1, 128>}]} {
    %c0_i32 = arith.constant 0 : i32
    %0 = arith.cmpi eq, %arg0, %c0_i32 : i32
    %1 = arith.extui %0 : i1 to i32
    %c0_i32_0 = arith.constant 0 : i32
    %2 = arith.cmpi ne, %1, %c0_i32_0 : i32
    scf.if %2 {
      %cst_14 = arith.constant 0.000000e+00 : f32
      %17 = vector.broadcast %cst_14 : f32 to vector<1x128xf32>
      %c0_15 = arith.constant 0 : index
      %c0_16 = arith.constant 0 : index
      %18 = vector.load %arg3[%c0_15, %c0_16] : memref<1x128xf32, #tpu.memory_space<vmem>>, vector<1x128xf32>
      tpu.vector_store %arg3[%c0_15, %c0_16], %17 {strides = array<i32>} : memref<1x128xf32, #tpu.memory_space<vmem>>, vector<1x128xf32>,
      %cst_17 = arith.constant 0.000000e+00 : f32
      %19 = vector.broadcast %cst_17 : f32 to vector<1x128xf32>
      %c0_18 = arith.constant 0 : index
      %c0_19 = arith.constant 0 : index
      %20 = vector.load %arg4[%c0_18, %c0_19] : memref<1x128xf32, #tpu.memory_space<vmem>>, vector<1x128xf32>
      tpu.vector_store %arg4[%c0_18, %c0_19], %19 {strides = array<i32>} : memref<1x128xf32, #tpu.memory_space<vmem>>, vector<1x128xf32>,
    } else {
    }
    %c0 = arith.constant 0 : index
    %c0_1 = arith.constant 0 : index
    %3 = vector.load %arg1[%c0, %c0_1] : memref<16x128xbf16, #tpu.memory_space<vmem>>, vector<16x128xbf16>
    %c0_2 = arith.constant 0 : index
    %c0_3 = arith.constant 0 : index
    %4 = vector.load %arg2[%c0_2, %c0_3] : memref<128x128xbf16, #tpu.memory_space<vmem>>, vector<128x128xbf16>
    %cst = arith.constant dense<0.000000e+00> : vector<16x128xf32>
    %5 = tpu.matmul %3, %4, %cst {dimension_numbers = #tpu.dot_dimension_numbers<[1], [0], [0], [1], [0, 0, 1, 1], [], []>} : vector<16x128xbf16>, vector<128x128xbf16>, vector<16x128xf32> -> vector<16x128xf32>
    %c0_4 = arith.constant 0 : index
    %c0_5 = arith.constant 0 : index
    %6 = vector.load %arg3[%c0_4, %c0_5] : memref<1x128xf32, #tpu.memory_space<vmem>>, vector<1x128xf32>
    %cst_6 = arith.constant dense<0.000000e+00> : vector<128xf32>
    %7 = vector.multi_reduction <add>, %5, %cst_6 [0] : vector<16x128xf32> to vector<128xf32>
    %8 = vector.shape_cast %7 : vector<128xf32> to vector<1x128xf32>
    %9 = arith.addf %6, %8 : vector<1x128xf32>
    %c0_7 = arith.constant 0 : index
    %c0_8 = arith.constant 0 : index
    %10 = vector.load %arg3[%c0_7, %c0_8] : memref<1x128xf32, #tpu.memory_space<vmem>>, vector<1x128xf32>
    tpu.vector_store %arg3[%c0_7, %c0_8], %9 {strides = array<i32>} : memref<1x128xf32, #tpu.memory_space<vmem>>, vector<1x128xf32>,
    %c0_9 = arith.constant 0 : index
    %c0_10 = arith.constant 0 : index
    %11 = vector.load %arg4[%c0_9, %c0_10] : memref<1x128xf32, #tpu.memory_space<vmem>>, vector<1x128xf32>
    %12 = arith.mulf %5, %5 : vector<16x128xf32>
    %cst_11 = arith.constant dense<0.000000e+00> : vector<128xf32>
    %13 = vector.multi_reduction <add>, %12, %cst_11 [0] : vector<16x128xf32> to vector<128xf32>
    %14 = vector.shape_cast %13 : vector<128xf32> to vector<1x128xf32>
    %15 = arith.addf %11, %14 : vector<1x128xf32>
    %c0_12 = arith.constant 0 : index
    %c0_13 = arith.constant 0 : index
    %16 = vector.load %arg4[%c0_12, %c0_13] : memref<1x128xf32, #tpu.memory_space<vmem>>, vector<1x128xf32>
    tpu.vector_store %arg4[%c0_12, %c0_13], %15 {strides = array<i32>} : memref<1x128xf32, #tpu.memory_space<vmem>>, vector<1x128xf32>,
    return
  }
  func.func @transform_0(%arg0: i32) -> (i32, i32) {
    %c0_i32 = arith.constant 0 : i32
    %c0_i32_0 = arith.constant 0 : i32
    return %arg0, %c0_i32 : i32, i32
  }
  func.func @transform_1(%arg0: i32) -> (i32, i32) {
    %c0_i32 = arith.constant 0 : i32
    %c0_i32_0 = arith.constant 0 : i32
    %c0_i32_1 = arith.constant 0 : i32
    return %c0_i32, %c0_i32_0 : i32, i32
  }
  func.func @transform_2(%arg0: i32) -> (i32, i32) {
    %c0_i32 = arith.constant 0 : i32
    %c0_i32_0 = arith.constant 0 : i32
    %c0_i32_1 = arith.constant 0 : i32
    return %c0_i32, %c0_i32_0 : i32, i32
  }
  func.func @transform_3(%arg0: i32) -> (i32, i32) {
    %c0_i32 = arith.constant 0 : i32
    %c0_i32_0 = arith.constant 0 : i32
    %c0_i32_1 = arith.constant 0 : i32
    return %c0_i32, %c0_i32_0 : i32, i32
  }
}

</mosaic_0001>

<bundles_post_ra>
// kernel: tpu_custom_call.1
= control target key start
LH: loop header
LB: loop body
LE: loop exit
PB: predicated region body
PF: predicated region fallthrough
CT: control target
= control target key end

     0   :  { %9 = vsyncpa [#allocation3], 0  ;;  %s398_s0 = inlined_call_operand.hbm [shape: bf16[16,128], index: 0, kind: input, shape index: {}]   ;;  %s399_s1 = inlined_call_operand.hbm [shape: bf16[128,128], index: 1, kind: input, shape index: {}]   ;;  %s400_s2 = inlined_call_operand.hbm [shape: f32[1,128], index: 2, kind: output, shape index: {0}]   ;;  %s401_s3 = inlined_call_operand.hbm [shape: f32[1,128], index: 3, kind: output, shape index: {1}]  }
   0x1   :  { %10 = vsyncpa [#allocation6], 0 }
   0x2   :  { %11 = vsyncpa [#allocation4], 0 }
   0x3   :  { %12 = vsyncpa [#allocation9], 0  ;;  %s358_s12 = smov [#allocation2]  }
   0x4   :  { %s18_s13 = sshll.u32 %s358_s12, 4  ;;  %s19_s13 = int_to_ptr.vmem [resolvable:$true] %s18_s13 }
   0x5   :  { %s278_s14 = scalar_lea.vmem %s19_s13, 128  ;;  %p283_p1 = scmp.lt.s32.totalorder %s19_s13, %s19_s13 }
   0x6   :  { %p279_p0 = scmp.ne.s32.totalorder %s19_s13, %s278_s14  ;;  %p284_p2 = scmp.lt.s32.totalorder %s278_s14, %s278_s14 }
   0x8   :  { %p285_p3 = por %p284_p2, %p283_p1 }
   0xa   :  { %p286_p4 = pnand %p285_p3, %p279_p0 }
   0xc   :  { %289 = shalt.err (!%p286_p4)
}
   0xd   :  { %s359_s15 = smov 64   ;;  %s360_s16 = smov 4  }
   0xe   :  { %24 = dma.hbm_to_vmem [thread:$0]  %s398_s0, 128, %s19_s13, [#allocation3], %s359_s15, %s359_s15, %s360_s16  }
   0xf   :  { %s361_s19 = smov [#allocation5]  }
  0x10   :  { %s30_s20 = sshll.u32 %s361_s19, 4  ;;  %s31_s20 = int_to_ptr.vmem [resolvable:$true] %s30_s20 }
  0x11   :  { %s298_s21 = scalar_lea.vmem %s31_s20, 1024  ;;  %p303_p6 = scmp.lt.s32.totalorder %s31_s20, %s31_s20 }
  0x12   :  { %p299_p5 = scmp.ne.s32.totalorder %s31_s20, %s298_s21  ;;  %p304_p7 = scmp.lt.s32.totalorder %s298_s21, %s298_s21 }
  0x14   :  { %p305_p8 = por %p304_p7, %p303_p6 }
  0x16   :  { %p306_p9 = pnand %p305_p8, %p299_p5 }
  0x18   :  { %309 = shalt.err (!%p306_p9)
}
  0x19   :  { %36 = dma.hbm_to_vmem [thread:$0]  %s399_s1, 1024, %s31_s20, [#allocation6], %s359_s15, %s359_s15, %s360_s16  }
  0x1a   :  { %350 = dma.done.wait [#allocation3], 128  }
  0x1b   :  { %351 = vsyncadd [#allocation3], 4294967168 }
  0x1c   :  { %352 = dma.done.wait [#allocation6], 1024  }
  0x1d   :  { %353 = vsyncadd [#allocation6], 4294966272  ;;  %v362_v0 = vmov 0.0   ;;  %vm363_vm0 = vmmov 0   ;;  %v261_v1 = vld [vmem:[#allocation5 + $0x38] sm:$0xff]   ;;  %v262_v2 = vld [vmem:[#allocation5 + $0x30] sm:$0xff]  }
  0x1e   :  { %233 = vmatprep.subr.bf16.mxu0 %v362_v0  ;;  %48 = vst [vmem:[#allocation7] sm:$0x1] %v362_v0  ;;  %49 = vst [vmem:[#allocation8] sm:$0x1] %v362_v0  ;;  %249 = vmatprep.mubr.msk.bf16.mxu0 %vm363_vm0, %v362_v0  ;;  %v263_v3 = vld [vmem:[#allocation5 + $0x28] sm:$0xff]   ;;  %v264_v4 = vld [vmem:[#allocation5 + $0x20] sm:$0xff]  }
  0x1f   :  { %234 = vmatpush3.bf16.msra.mxu0 %v261_v1  ;;  %v265_v5 = vld [vmem:[#allocation5 + $0x18] sm:$0xff]   ;;  %v266_v6 = vld [vmem:[#allocation5 + $0x10] sm:$0xff]   ;;  %v267_v7 = vld [vmem:[#allocation5 + $0x8] sm:$0xff]   ;;  %s364_s0 = smov [#allocation7]   ;;  %s365_s24 = smov [#allocation8]  }
  0x20   :  { %235 = vmatprep.subr.bf16.mxu0 %v362_v0  ;;  %v268_v8 = vld [vmem:[#allocation5] sm:$0xff]   ;;  %v269_v9 = vld [vmem:[#allocation2] sm:$0xff]   ;;  %s191_s1 = sshll.u32 %s364_s0, 4  ;;  %s201_s25 = sshll.u32 %s365_s24, 4  ;;  %s192_s1 = int_to_ptr.vmem [resolvable:$true] %s191_s1  ;;  %s202_s25 = int_to_ptr.vmem [resolvable:$true] %s201_s25 }
  0x21   :  { %s310_s26 = scalar_lea.vmem %s192_s1, 16  ;;  %s314_s27 = scalar_lea.vmem %s192_s1, 32 }
  0x22   :  { %p311_p10 = scmp.ne.s32.totalorder %s192_s1, %s310_s26  ;;  %p315_p11 = scmp.lt.s32.totalorder %s192_s1, %s192_s1 }
  0x23   :  { %236 = vmatpush3.bf16.msra.mxu0 %v262_v2  ;;  %p316_p12 = scmp.lt.s32.totalorder %s314_s27, %s310_s26 }
  0x24   :  { %237 = vmatprep.subr.bf16.mxu0 %v362_v0 }
  0x25   :  { %v163_v27 = vld [vmem:[#allocation7] sm:$0x1]  ;;  %v173_v30 = vld [vmem:[#allocation8] sm:$0x1]  ;;  %p317_p13 = por %p316_p12, %p315_p11 }
  0x27   :  { %238 = vmatpush3.bf16.msra.mxu0 %v263_v3  ;;  %p318_p0 = pnand %p317_p13, %p311_p10 }
  0x28   :  { %239 = vmatprep.subr.bf16.mxu0 %v362_v0 }
  0x2b   :  { %240 = vmatpush3.bf16.msra.mxu0 %v264_v4 }
  0x2c   :  { %241 = vmatprep.subr.bf16.mxu0 %v362_v0 }
  0x2f   :  { %242 = vmatpush3.bf16.msra.mxu0 %v265_v5 }
  0x30   :  { %243 = vmatprep.subr.bf16.mxu0 %v362_v0 }
  0x33   :  { %244 = vmatpush3.bf16.msra.mxu0 %v266_v6 }
  0x34   :  { %245 = vmatprep.subr.bf16.mxu0 %v362_v0 }
  0x37   :  { %246 = vmatpush3.bf16.msra.mxu0 %v267_v7 }
  0x38   :  { %247 = vmatprep.subr.bf16.mxu0 %v362_v0 }
  0x3b   :  { %248 = vmatpush3.bf16.msra.mxu0 %v268_v8 }
  0x3e   :  { %250 = vmatmul.mubr.bf16.vlgmr.msra.gmra.mxu0 %v269_v9 }
  0xfe   :  { %v156_v10 = vpop.f32.mrf.mxu0 }
  0xff   :  { %v174_v13 = vmul.f32 %v156_v10, %v156_v10 }
 0x100   :  { %v251_v11 = vpop.f32.mrf.mxu0 }
 0x102   :  { %v159_v12 = vpop.f32.mrf.mxu0 }
 0x103   :  { %v164_v14 = vadd.f32 %v159_v12, %v156_v10  ;;  %v175_v15 = vmul.f32 %v159_v12, %v159_v12 }
 0x104   :  { %v252_v16 = vpop.f32.mrf.mxu0 }
 0x105   :  { %v165_v17 = vrot.slane %v164_v14, 4  ;;  %v176_v18 = vadd.f32 %v175_v15, %v174_v13 }
 0x107   :  { %v166_v19 = vadd.f32 %v165_v17, %v164_v14  ;;  %v177_v20 = vrot.slane %v176_v18, 4 }
 0x109   :  { %v167_v21 = vrot.slane %v166_v19, 2  ;;  %v178_v22 = vadd.f32 %v177_v20, %v176_v18 }
 0x10b   :  { %v168_v23 = vadd.f32 %v167_v21, %v166_v19  ;;  %v179_v24 = vrot.slane %v178_v22, 2 }
 0x10d   :  { %v169_v25 = vrot.slane %v168_v23, 1  ;;  %v180_v26 = vadd.f32 %v179_v24, %v178_v22 }
 0x10f   :  { %v170_v28 = vadd.f32 %v169_v25, %v168_v23  ;;  %v181_v29 = vrot.slane %v180_v26, 1 }
 0x111   :  { %v171_v31 = vadd.f32 %v170_v28, %v163_v27  ;;  %v182_v32 = vadd.f32 %v181_v29, %v180_v26 }
 0x113   :  { %172 = vst [vmem:[#allocation7] sm:$0x1] %v171_v31  ;;  %v183_v33 = vadd.f32 %v182_v32, %v173_v30 }
 0x114   :  { %321 = shalt.err (!%p318_p0)
}
 0x115   :  { %194 = dma.vmem_to_hbm [thread:$0]  %s192_s1, 16, %s400_s2, [#allocation4]   ;;  %184 = vst [vmem:[#allocation8] sm:$0x1] %v183_v33 }
 0x116   :  { %s330_s30 = scalar_lea.vmem %s202_s25, 16  ;;  %s334_s4 = scalar_lea.vmem %s202_s25, 32 }
 0x117   :  { %p331_p1 = scmp.ne.s32.totalorder %s202_s25, %s330_s30  ;;  %p335_p2 = scmp.lt.s32.totalorder %s202_s25, %s202_s25 }
 0x118   :  { %p336_p3 = scmp.lt.s32.totalorder %s334_s4, %s330_s30 }
 0x11a   :  { %p337_p4 = por %p336_p3, %p335_p2 }
 0x11c   :  { %p338_p5 = pnand %p337_p4, %p331_p1 }
 0x11e   :  { %341 = shalt.err (!%p338_p5)
}
 0x11f   :  { %204 = dma.vmem_to_hbm [thread:$0]  %s202_s25, 16, %s401_s3, [#allocation9]  }
 0x120   :  { %354 = dma.done.wait [#allocation4], 16  }
 0x121   :  { %355 = vsyncadd [#allocation4], 4294967280 }
 0x122   :  { %356 = dma.done.wait [#allocation9], 16  }
 0x123   :  { %357 = vsyncadd [#allocation9], 4294967280 }
 0x124   :  { %211 = vsyncpa [#allocation3], 1 }
 0x125   :  { %212 = vsyncpa [#allocation6], 1 }
 0x126   :  { %213 = vsyncpa [#allocation4], 1 }
 0x127   :  { %214 = vsyncpa [#allocation9], 1 }

</bundles_post_ra>
